<compile_context>
chip_gen: v7x
topology: tpu7x:2x2x1
jax: 0.10.0
libtpu: 0.0.40
codegen_flags: <defaults>
</compile_context>

<pallas_src>
import functools

import jax
import jax.numpy as jnp
from jax.experimental import pallas as pl
from jax.experimental.pallas import tpu as pltpu

_MiB = 1024 * 1024


def _round_up(x, m):
    return ((x + m - 1) // m) * m


def _sublane(dtype):
    return {1: 32, 2: 16, 4: 8}.get(jnp.dtype(dtype).itemsize, 8)


def _tpu_defaults():
    """(tm_target, buffer_budget_bytes, vmem_limit_bytes) per TPU generation."""
    kind = ""
    try:
        kind = jax.devices()[0].device_kind.lower()
    except Exception:
        pass
    if "v7" in kind or "7x" in kind:
        # 64 MiB VMEM per TensorCore, ~3.2 TB/s HBM, 996 TF/s bf16.
        return 384, 36 * _MiB, 52 * _MiB
    if "v6" in kind:
        # 128 MiB VMEM, ~1.4 TB/s HBM, 918 TF/s bf16 -> wants the biggest tm.
        return 512, 80 * _MiB, 100 * _MiB
    if "v5" in kind:
        # 128 MiB VMEM, ~0.82 TB/s HBM, 197 TF/s bf16.
        return 256, 80 * _MiB, 100 * _MiB
    # Unknown part: stay conservative enough to fit a 64 MiB VMEM TensorCore.
    return 320, 36 * _MiB, 52 * _MiB


def _vmem_bytes(tm, th, in_p, out_p, cbytes, obytes):
    """Full accounting of pipelined VMEM buffers for one (tm, th) choice."""
    x_tile = 2 * tm * in_p * cbytes            # double-buffered x tile
    w12 = 2 * (2 * in_p * th) * cbytes         # double-buffered W1 + W2 tiles
    w3 = 2 * th * out_p * cbytes               # double-buffered W3 tile
    biases = 2 * (2 * th + out_p) * 4          # b1/b2/b3 slices (f32)
    out_tile = 2 * tm * out_p * obytes         # double-buffered output tile
    acc = tm * out_p * 4                       # f32 accumulator scratch
    return x_tile + w12 + w3 + biases + out_tile + acc


def _pick_tiles(M, hidden, in_p, out_p, cbytes, obytes, sublane, tm_target, budget):
    """Largest (token tile, hidden tile) that fits the VMEM buffer budget."""
    m_cap = _round_up(max(M, 1), sublane)
    base = [1024, 768, 512, 384, 256, 192, 128, 96, 64, 48, 32, 16, 8]
    cands = [tm_target] + [t for t in base if t < tm_target] + [sublane]
    cands = sorted({_round_up(min(t, m_cap), sublane) for t in cands}, reverse=True)
    th_cands = [t for t in (1024, 512, 256, 128) if hidden % t == 0] or [hidden]
    for tm in cands:                 # tm first: it sets the FLOPs/weight-byte ratio
        for th in th_cands:          # then the biggest hidden tile that still fits
            if _vmem_bytes(tm, th, in_p, out_p, cbytes, obytes) <= budget:
                return tm, th
    # Nothing fits (enormous feature dims) -> smallest combo, let compiler try.
    # TODO(synk): add an out-feature grid axis for very large out_p on v7x.
    return cands[-1], th_cands[-1]


def _ffn_kernel(x_ref, w1_ref, b1_ref, w2_ref, b2_ref, w3_ref, b3_ref,
                o_ref, acc_ref):
    """Fused SwiGLU FFN over one (token-tile, hidden-tile) grid point.

    x_ref : (tm, in_p)   VMEM (compute dtype)
    w1_ref: (in_p, th)   VMEM   b1_ref: (1, th)   f32
    w2_ref: (in_p, th)   VMEM   b2_ref: (1, th)   f32
    w3_ref: (th, out_p)  VMEM   b3_ref: (1, out_p) f32
    o_ref : (tm, out_p)  VMEM (output dtype)
    acc_ref:(tm, out_p)  VMEM f32 scratch (accumulator over the hidden axis)
    """
    h = pl.program_id(1)

    x = x_ref[...]
    g = jnp.dot(x, w1_ref[...], preferred_element_type=jnp.float32) + b1_ref[...]
    u = jnp.dot(x, w2_ref[...], preferred_element_type=jnp.float32) + b2_ref[...]
    s = (g * jax.nn.sigmoid(g)) * u                          # SiLU(g) * u, in f32
    p = jnp.dot(s.astype(w3_ref.dtype), w3_ref[...],
                preferred_element_type=jnp.float32)

    @pl.when(h == 0)
    def _first():                                            # direct write: no zero+add
        acc_ref[...] = p

    @pl.when(h > 0)
    def _accumulate():
        acc_ref[...] += p

    @pl.when(h == pl.num_programs(1) - 1)
    def _finalize():
        o_ref[...] = (acc_ref[...] + b3_ref[...]).astype(o_ref.dtype)


def prepare_feedforward_params(w1, b1, w2, b2, w3, b3,
                               compute_dtype=jnp.bfloat16):
    """Pad feature dims to lane multiples (128) and cast weights to the MXU
    compute dtype ONCE (hoisted out of the per-call path).
    Weights are [in, out] layout; biases any of (d,) or (1, d)."""
    in_f, hidden = w1.shape
    out_f = w3.shape[1]
    in_p = _round_up(in_f, 128)
    out_p = _round_up(out_f, 128)
    # TODO(synk): on v7x, fp8 weight storage (MXU fp8 path) is a further option.
    w1p = jnp.pad(w1, ((0, in_p - in_f), (0, 0))).astype(compute_dtype)
    w2p = jnp.pad(w2, ((0, in_p - in_f), (0, 0))).astype(compute_dtype)
    w3p = jnp.pad(w3, ((0, 0), (0, out_p - out_f))).astype(compute_dtype)
    b1p = jnp.reshape(b1, (1, hidden)).astype(jnp.float32)
    b2p = jnp.reshape(b2, (1, hidden)).astype(jnp.float32)
    b3p = jnp.pad(jnp.reshape(b3, (1, out_f)),
                  ((0, 0), (0, out_p - out_f))).astype(jnp.float32)
    return w1p, b1p, w2p, b2p, w3p, b3p


@functools.partial(jax.jit, static_argnames=("out_features", "tm"))
def feedforward(x, w1p, b1p, w2p, b2p, w3p, b3p, *, out_features, tm=None):
    """x: (M, in_features).  Weights come from prepare_feedforward_params."""
    M, in_f = x.shape
    in_p, hidden = w1p.shape
    out_p = w3p.shape[1]
    compute_dtype = w1p.dtype
    out_dtype = x.dtype
    cbytes = jnp.dtype(compute_dtype).itemsize
    obytes = jnp.dtype(out_dtype).itemsize
    sublane = _sublane(compute_dtype)

    tm_target, budget, vmem_limit = _tpu_defaults()
    if tm is not None:
        tm_target = tm

    tm_eff, th = _pick_tiles(M, hidden, in_p, out_p, cbytes, obytes,
                             sublane, tm_target, budget)
    m_p = _round_up(M, tm_eff)

    xp = x
    if (m_p, in_p) != (M, in_f):
        xp = jnp.pad(xp, ((0, m_p - M), (0, in_p - in_f)))
    if xp.dtype != compute_dtype:
        xp = xp.astype(compute_dtype)

    grid = (m_p // tm_eff, hidden // th)   # reduction (hidden) axis last

    out = pl.pallas_call(
        _ffn_kernel,
        out_shape=jax.ShapeDtypeStruct((m_p, out_p), out_dtype),
        grid_spec=pltpu.PrefetchScalarGridSpec(
            num_scalar_prefetch=0,
            grid=grid,
            in_specs=[
                pl.BlockSpec((tm_eff, in_p), lambda i, h: (i, 0)),   # x tile
                pl.BlockSpec((in_p, th),     lambda i, h: (0, h)),   # W1 cols
                pl.BlockSpec((1, th),        lambda i, h: (0, h)),   # b1 slice
                pl.BlockSpec((in_p, th),     lambda i, h: (0, h)),   # W2 cols
                pl.BlockSpec((1, th),        lambda i, h: (0, h)),   # b2 slice
                pl.BlockSpec((th, out_p),    lambda i, h: (h, 0)),   # W3 rows
                pl.BlockSpec((1, out_p),     lambda i, h: (0, 0)),   # b3
            ],
            out_specs=pl.BlockSpec((tm_eff, out_p), lambda i, h: (i, 0)),
            scratch_shapes=[pltpu.VMEM((tm_eff, out_p), jnp.float32)],
        ),
        compiler_params=pltpu.CompilerParams(
            # token axis parallel (megacore on v7x), hidden axis is a reduction
            dimension_semantics=("parallel", "arbitrary"),
            vmem_limit_bytes=vmem_limit,
        ),
    )(xp, w1p, b1p, w2p, b2p, w3p, b3p)
    return out[:M, :out_features]


def init_feedforward_params(key, in_features, hidden_features, out_features,
                            multiple_of=256, dtype=jnp.float32):
    """Deterministic init mirroring the module's shapes; weights [in, out]."""
    hidden = multiple_of * ((hidden_features + multiple_of - 1) // multiple_of)
    k1, k2, k3, k4, k5, k6 = jax.random.split(key, 6)
    s_in = 1.0 / jnp.sqrt(in_features)
    s_h = 1.0 / jnp.sqrt(hidden)
    w1 = jax.random.uniform(k1, (in_features, hidden), dtype, -s_in, s_in)
    b1 = jax.random.uniform(k2, (1, hidden), dtype, -s_in, s_in)
    w2 = jax.random.uniform(k3, (in_features, hidden), dtype, -s_in, s_in)
    b2 = jax.random.uniform(k4, (1, hidden), dtype, -s_in, s_in)
    w3 = jax.random.uniform(k5, (hidden, out_features), dtype, -s_h, s_h)
    b3 = jax.random.uniform(k6, (1, out_features), dtype, -s_h, s_h)
    return w1, b1, w2, b2, w3, b3


if __name__ == "__main__":
    # Small shapes: batch=2, seq=8, in=32, hidden=32 (rounded up to 256), out=32.
    batch, seq = 2, 8
    in_features, hidden_features, out_features = 32, 32, 32

    key = jax.random.PRNGKey(0)
    kx, kp = jax.random.split(key)

    x = jax.random.normal(kx, (batch, seq, in_features), jnp.float32)
    w1, b1, w2, b2, w3, b3 = init_feedforward_params(
        kp, in_features, hidden_features, out_features)

    x2d = x.reshape(batch * seq, in_features)

    # Pure-JAX f32 reference of the SwiGLU FFN semantics.
    h1 = x2d @ w1 + b1
    h2 = x2d @ w2 + b2
    ref = ((h1 * jax.nn.sigmoid(h1)) * h2) @ w3 + b3

    # Exact-semantics path (f32 compute), tight tolerance.
    params_f32 = prepare_feedforward_params(w1, b1, w2, b2, w3, b3,
                                            compute_dtype=jnp.float32)
    out_f32 = feedforward(x2d, *params_f32, out_features=out_features)
    jax.block_until_ready(out_f32)
    assert out_f32.shape == (batch * seq, out_features)
    assert jnp.allclose(out_f32, ref, atol=1e-4, rtol=1e-4), "f32 path mismatch"

    # Default fast path: bf16 MXU compute with f32 accumulation.
    params_bf16 = prepare_feedforward_params(w1, b1, w2, b2, w3, b3)
    out_bf16 = feedforward(x2d, *params_bf16, out_features=out_features)
    jax.block_until_ready(out_bf16)
    assert jnp.allclose(out_bf16, ref, atol=5e-2, rtol=5e-2), "bf16 path mismatch"

    out = out_bf16.reshape(batch, seq, out_features)
    jax.block_until_ready(out)
    print("KERNEL_OK")
</pallas_src>

<mosaic_0001>
module attributes {stable_mosaic.version = 11 : i64} {
  func.func @_ffn_kernel(%arg0: i32, %arg1: i32, %arg2: memref<16x128xf32, #tpu.memory_space<vmem>>, %arg3: memref<128x256xf32, #tpu.memory_space<vmem>>, %arg4: memref<1x256xf32, #tpu.memory_space<vmem>>, %arg5: memref<128x256xf32, #tpu.memory_space<vmem>>, %arg6: memref<1x256xf32, #tpu.memory_space<vmem>>, %arg7: memref<256x128xf32, #tpu.memory_space<vmem>>, %arg8: memref<1x128xf32, #tpu.memory_space<vmem>>, %arg9: memref<16x128xf32, #tpu.memory_space<vmem>>, %arg10: memref<16x128xf32, #tpu.memory_space<vmem>>) attributes {dimension_semantics = [#tpu.dimension_semantics<parallel>, #tpu.dimension_semantics<arbitrary>], iteration_bounds = array<i64: 1, 1>, scalar_prefetch = 0 : i64, scratch_operands = 1 : i64, tpu.core_type = #tpu.core_type<tc>, window_params = [{transform_indices = @transform_0, window_bounds = array<i64: 16, 128>}, {transform_indices = @transform_1, window_bounds = array<i64: 128, 256>}, {transform_indices = @transform_2, window_bounds = array<i64: 1, 256>}, {transform_indices = @transform_3, window_bounds = array<i64: 128, 256>}, {transform_indices = @transform_4, window_bounds = array<i64: 1, 256>}, {transform_indices = @transform_5, window_bounds = array<i64: 256, 128>}, {pipeline_mode = #tpu.pipeline_mode<synchronous>, transform_indices = @transform_6, window_bounds = array<i64: 1, 128>}, {transform_indices = @transform_7, window_bounds = array<i64: 16, 128>}]} {
    %c0 = arith.constant 0 : index
    %c0_0 = arith.constant 0 : index
    %0 = vector.load %arg2[%c0, %c0_0] : memref<16x128xf32, #tpu.memory_space<vmem>>, vector<16x128xf32>
    %c0_1 = arith.constant 0 : index
    %c0_2 = arith.constant 0 : index
    %1 = vector.load %arg3[%c0_1, %c0_2] : memref<128x256xf32, #tpu.memory_space<vmem>>, vector<128x256xf32>
    %cst = arith.constant dense<0.000000e+00> : vector<16x256xf32>
    %2 = tpu.matmul %0, %1, %cst {dimension_numbers = #tpu.dot_dimension_numbers<[1], [0], [0], [1], [0, 0, 1, 1], [], []>} : vector<16x128xf32>, vector<128x256xf32>, vector<16x256xf32> -> vector<16x256xf32>
    %c0_3 = arith.constant 0 : index
    %c0_4 = arith.constant 0 : index
    %3 = vector.load %arg4[%c0_3, %c0_4] : memref<1x256xf32, #tpu.memory_space<vmem>>, vector<1x256xf32>
    %4 = vector.broadcast %3 : vector<1x256xf32> to vector<16x256xf32>
    %5 = arith.addf %2, %4 : vector<16x256xf32>
    %c0_5 = arith.constant 0 : index
    %c0_6 = arith.constant 0 : index
    %6 = vector.load %arg5[%c0_5, %c0_6] : memref<128x256xf32, #tpu.memory_space<vmem>>, vector<128x256xf32>
    %cst_7 = arith.constant dense<0.000000e+00> : vector<16x256xf32>
    %7 = tpu.matmul %0, %6, %cst_7 {dimension_numbers = #tpu.dot_dimension_numbers<[1], [0], [0], [1], [0, 0, 1, 1], [], []>} : vector<16x128xf32>, vector<128x256xf32>, vector<16x256xf32> -> vector<16x256xf32>
    %c0_8 = arith.constant 0 : index
    %c0_9 = arith.constant 0 : index
    %8 = vector.load %arg6[%c0_8, %c0_9] : memref<1x256xf32, #tpu.memory_space<vmem>>, vector<1x256xf32>
    %9 = vector.broadcast %8 : vector<1x256xf32> to vector<16x256xf32>
    %10 = arith.addf %7, %9 : vector<16x256xf32>
    %11 = arith.negf %5 : vector<16x256xf32>
    %12 = math.exp %11 : vector<16x256xf32>
    %cst_10 = arith.constant 1.000000e+00 : f32
    %13 = vector.broadcast %cst_10 : f32 to vector<16x256xf32>
    %14 = arith.addf %13, %12 : vector<16x256xf32>
    %15 = arith.divf %13, %14 : vector<16x256xf32>
    %16 = arith.mulf %5, %15 : vector<16x256xf32>
    %17 = arith.mulf %16, %10 : vector<16x256xf32>
    %c0_11 = arith.constant 0 : index
    %c0_12 = arith.constant 0 : index
    %18 = vector.load %arg7[%c0_11, %c0_12] : memref<256x128xf32, #tpu.memory_space<vmem>>, vector<256x128xf32>
    %cst_13 = arith.constant dense<0.000000e+00> : vector<16x128xf32>
    %19 = tpu.matmul %17, %18, %cst_13 {dimension_numbers = #tpu.dot_dimension_numbers<[1], [0], [0], [1], [0, 0, 1, 1], [], []>} : vector<16x256xf32>, vector<256x128xf32>, vector<16x128xf32> -> vector<16x128xf32>
    %c0_i32 = arith.constant 0 : i32
    %20 = arith.cmpi eq, %arg1, %c0_i32 : i32
    %21 = arith.extui %20 : i1 to i32
    %c0_i32_14 = arith.constant 0 : i32
    %22 = arith.cmpi ne, %21, %c0_i32_14 : i32
    scf.if %22 {
      %c0_19 = arith.constant 0 : index
      %c0_20 = arith.constant 0 : index
      %29 = vector.load %arg10[%c0_19, %c0_20] : memref<16x128xf32, #tpu.memory_space<vmem>>, vector<16x128xf32>
      tpu.vector_store %arg10[%c0_19, %c0_20], %19 {strides = array<i32>} : memref<16x128xf32, #tpu.memory_space<vmem>>, vector<16x128xf32>,
    } else {
    }
    %c0_i32_15 = arith.constant 0 : i32
    %23 = arith.cmpi sgt, %arg1, %c0_i32_15 : i32
    %24 = arith.extui %23 : i1 to i32
    %c0_i32_16 = arith.constant 0 : i32
    %25 = arith.cmpi ne, %24, %c0_i32_16 : i32
    scf.if %25 {
      %c0_19 = arith.constant 0 : index
      %c0_20 = arith.constant 0 : index
      %29 = vector.load %arg10[%c0_19, %c0_20] : memref<16x128xf32, #tpu.memory_space<vmem>>, vector<16x128xf32>
      %30 = arith.addf %29, %19 : vector<16x128xf32>
      %c0_21 = arith.constant 0 : index
      %c0_22 = arith.constant 0 : index
      %31 = vector.load %arg10[%c0_21, %c0_22] : memref<16x128xf32, #tpu.memory_space<vmem>>, vector<16x128xf32>
      tpu.vector_store %arg10[%c0_21, %c0_22], %30 {strides = array<i32>} : memref<16x128xf32, #tpu.memory_space<vmem>>, vector<16x128xf32>,
    } else {
    }
    %c0_i32_17 = arith.constant 0 : i32
    %26 = arith.cmpi eq, %arg1, %c0_i32_17 : i32
    %27 = arith.extui %26 : i1 to i32
    %c0_i32_18 = arith.constant 0 : i32
    %28 = arith.cmpi ne, %27, %c0_i32_18 : i32
    scf.if %28 {
      %c0_19 = arith.constant 0 : index
      %c0_20 = arith.constant 0 : index
      %29 = vector.load %arg10[%c0_19, %c0_20] : memref<16x128xf32, #tpu.memory_space<vmem>>, vector<16x128xf32>
      %c0_21 = arith.constant 0 : index
      %c0_22 = arith.constant 0 : index
      %30 = vector.load %arg8[%c0_21, %c0_22] : memref<1x128xf32, #tpu.memory_space<vmem>>, vector<1x128xf32>
      %31 = vector.broadcast %30 : vector<1x128xf32> to vector<16x128xf32>
      %32 = arith.addf %29, %31 : vector<16x128xf32>
      %c0_23 = arith.constant 0 : index
      %c0_24 = arith.constant 0 : index
      %33 = vector.load %arg9[%c0_23, %c0_24] : memref<16x128xf32, #tpu.memory_space<vmem>>, vector<16x128xf32>
      tpu.vector_store %arg9[%c0_23, %c0_24], %32 {strides = array<i32>} : memref<16x128xf32, #tpu.memory_space<vmem>>, vector<16x128xf32>,
    } else {
    }
    return
  }
  func.func @transform_0(%arg0: i32, %arg1: i32) -> (i32, i32) {
    %c0_i32 = arith.constant 0 : i32
    %c0_i32_0 = arith.constant 0 : i32
    return %arg0, %c0_i32 : i32, i32
  }
  func.func @transform_1(%arg0: i32, %arg1: i32) -> (i32, i32) {
    %c0_i32 = arith.constant 0 : i32
    %c0_i32_0 = arith.constant 0 : i32
    return %c0_i32, %arg1 : i32, i32
  }
  func.func @transform_2(%arg0: i32, %arg1: i32) -> (i32, i32) {
    %c0_i32 = arith.constant 0 : i32
    %c0_i32_0 = arith.constant 0 : i32
    return %c0_i32, %arg1 : i32, i32
  }
  func.func @transform_3(%arg0: i32, %arg1: i32) -> (i32, i32) {
    %c0_i32 = arith.constant 0 : i32
    %c0_i32_0 = arith.constant 0 : i32
    return %c0_i32, %arg1 : i32, i32
  }
  func.func @transform_4(%arg0: i32, %arg1: i32) -> (i32, i32) {
    %c0_i32 = arith.constant 0 : i32
    %c0_i32_0 = arith.constant 0 : i32
    return %c0_i32, %arg1 : i32, i32
  }
  func.func @transform_5(%arg0: i32, %arg1: i32) -> (i32, i32) {
    %c0_i32 = arith.constant 0 : i32
    %c0_i32_0 = arith.constant 0 : i32
    return %arg1, %c0_i32 : i32, i32
  }
  func.func @transform_6(%arg0: i32, %arg1: i32) -> (i32, i32) {
    %c0_i32 = arith.constant 0 : i32
    %c0_i32_0 = arith.constant 0 : i32
    %c0_i32_1 = arith.constant 0 : i32
    return %c0_i32, %c0_i32_0 : i32, i32
  }
  func.func @transform_7(%arg0: i32, %arg1: i32) -> (i32, i32) {
    %c0_i32 = arith.constant 0 : i32
    %c0_i32_0 = arith.constant 0 : i32
    return %arg0, %c0_i32 : i32, i32
  }
}

</mosaic_0001>

<bundles_post_ra>
// kernel: feedforward.1
= control target key start
LH: loop header
LB: loop body
LE: loop exit
PB: predicated region body
PF: predicated region fallthrough
CT: control target
= control target key end

     0   :  { %12 = vsyncpa [#allocation4], 0  ;;  %s904_s0 = inlined_call_operand.vmem [shape: f32[16,128], index: 0, kind: input, shape index: {}]   ;;  %s905_s1 = inlined_call_operand.hbm [shape: f32[128,256], index: 1, kind: input, shape index: {}]   ;;  %s906_s2 = inlined_call_operand.vmem [shape: f32[1,256], index: 2, kind: input, shape index: {}]   ;;  %s907_s3 = inlined_call_operand.hbm [shape: f32[128,256], index: 3, kind: input, shape index: {}]   ;;  %s908_s4 = inlined_call_operand.vmem [shape: f32[1,256], index: 4, kind: input, shape index: {}]   ;;  %s909_s5 = inlined_call_operand.hbm [shape: f32[256,128], index: 5, kind: input, shape index: {}]   ;;  %s910_s6 = inlined_call_operand.vmem [shape: f32[1,128], index: 6, kind: input, shape index: {}]   ;;  %s911_s7 = inlined_call_operand.hbm [shape: f32[16,128], index: 7, kind: output, shape index: {}]  }
   0x1   :  { %13 = vsyncpa [#allocation7], 0 }
   0x2   :  { %14 = vsyncpa [#allocation5], 0  ;;  %s775_s24 = smov [#allocation6]   ;;  %s776_s26 = smov [#allocation3]  }
   0x3   :  { %s36_s25 = sshll.u32 %s775_s24, 4  ;;  %s22_s27 = sshll.u32 %s776_s26, 4  ;;  %s37_s25 = int_to_ptr.vmem [resolvable:$true] %s36_s25  ;;  %s824_s27 = int_to_ptr.vmem [resolvable:$true] %s22_s27 }
   0x4   :  { %s681_s30 = scalar_lea.hbm %s907_s3, 4096 }
   0x5   :  { %p682_p0 = scmp.ne.s32.totalorder %s907_s3, %s681_s30  ;;  %p685_p1 = scmp.lt.u32.totalorder %s681_s30, %s907_s3 }
   0x7   :  { %p687_p2 = pnand %p685_p1, %p682_p0 }
   0x9   :  { %690 = shalt.err (!%p687_p2)
}
   0xa   :  { %s691_s12 = scalar_lea.vmem %s37_s25, 4096  ;;  %p696_p4 = scmp.lt.s32.totalorder %s37_s25, %s37_s25 }
   0xb   :  { %p692_p3 = scmp.ne.s32.totalorder %s37_s25, %s691_s12  ;;  %p697_p5 = scmp.lt.s32.totalorder %s691_s12, %s691_s12 }
   0xd   :  { %p698_p6 = por %p697_p5, %p696_p4 }
   0xf   :  { %p699_p7 = pnand %p698_p6, %p692_p3 }
  0x11   :  { %702 = shalt.err (!%p699_p7)
}
  0x12   :  { %s777_s13 = smov 256   ;;  %s778_s14 = smov 16  }
  0x13   :  { %42 = dma.hbm_to_vmem [thread:$0]  %s907_s3, 4096, %s37_s25, [#allocation7], %s777_s13, %s777_s13, %s778_s14  }
  0x14   :  { %s703_s19 = scalar_lea.hbm %s905_s1, 4096 }
  0x15   :  { %p704_p8 = scmp.ne.s32.totalorder %s905_s1, %s703_s19  ;;  %p707_p9 = scmp.lt.u32.totalorder %s703_s19, %s905_s1 }
  0x17   :  { %p709_p10 = pnand %p707_p9, %p704_p8 }
  0x19   :  { %712 = shalt.err (!%p709_p10)
}
  0x1a   :  { %s713_s24 = scalar_lea.vmem %s824_s27, 4096  ;;  %p718_p12 = scmp.lt.s32.totalorder %s824_s27, %s824_s27 }
  0x1b   :  { %p714_p11 = scmp.ne.s32.totalorder %s824_s27, %s713_s24  ;;  %p719_p13 = scmp.lt.s32.totalorder %s713_s24, %s713_s24 }
  0x1d   :  { %p720_p0 = por %p719_p13, %p718_p12 }
  0x1f   :  { %p721_p1 = pnand %p720_p0, %p714_p11 }
  0x21   :  { %724 = shalt.err (!%p721_p1)
}
  0x22   :  { %28 = dma.hbm_to_vmem [thread:$0]  %s905_s1, 4096, %s824_s27, [#allocation4], %s777_s13, %s777_s13, %s778_s14  }
  0x23   :  { %s779_s26 = smov [#allocation8]   ;;  %s725_s8 = scalar_lea.hbm %s909_s5, 4096 }
  0x24   :  { %s50_s28 = sshll.u32 %s779_s26, 4  ;;  %p726_p2 = scmp.ne.s32.totalorder %s909_s5, %s725_s8  ;;  %s51_s28 = int_to_ptr.vmem [resolvable:$true] %s50_s28 }
  0x25   :  { %p729_p3 = scmp.lt.u32.totalorder %s725_s8, %s909_s5 }
  0x27   :  { %p731_p4 = pnand %p729_p3, %p726_p2 }
  0x29   :  { %734 = shalt.err (!%p731_p4)
}
  0x2a   :  { %s735_s15 = scalar_lea.vmem %s51_s28, 4096  ;;  %p740_p6 = scmp.lt.s32.totalorder %s51_s28, %s51_s28 }
  0x2b   :  { %p736_p5 = scmp.ne.s32.totalorder %s51_s28, %s735_s15  ;;  %p741_p7 = scmp.lt.s32.totalorder %s735_s15, %s735_s15 }
  0x2d   :  { %p742_p8 = por %p741_p7, %p740_p6 }
  0x2f   :  { %p743_p9 = pnand %p742_p8, %p736_p5 }
  0x31   :  { %746 = shalt.err (!%p743_p9)
}
  0x32   :  { %s780_s1 = smov 128   ;;  %s781_s27 = smov 8  }
  0x33   :  { %56 = dma.hbm_to_vmem [thread:$0]  %s909_s5, 4096, %s51_s28, [#allocation7], %s780_s1, %s780_s1, %s781_s27  }
  0x34   :  { %769 = dma.done.wait [#allocation4], 4096  }
  0x35   :  { %770 = vsyncadd [#allocation4], 4294963200 }
  0x36   :  { %771 = dma.done.wait [#allocation7], 8192  }
  0x37   :  { %772 = vsyncadd [#allocation7], 4294959104  ;;  %v782_v0 = vmov 0.0   ;;  %v71_v1 = vld [vmem:[#allocation3 + $0x8] sm:$0xff]  ;;  %v73_v2 = vld [vmem:[#allocation3 + $0x18] sm:$0xff]  ;;  %s783_s22 = smov [#allocation9]  }
  0x38   :  { %178 = vmatprep.mubr.f32.mxu0 %v782_v0  ;;  %299 = vmatprep.mubr.f32.mxu1 %v782_v0  ;;  %v70_v3 = vld [vmem:[#allocation3] sm:$0xff]  ;;  %v544_v4 = vpack.c.bf16 %v73_v2, %v71_v1  ;;  %v72_v5 = vld [vmem:[#allocation3 + $0x10] sm:$0xff]  ;;  %v75_v6 = vld [vmem:[#allocation3 + $0x28] sm:$0xff]  ;;  %s488_s23 = sshll.u32 %s783_s22, 4  ;;  %s489_s23 = int_to_ptr.vmem [resolvable:$true] %s488_s23 }
  0x39   :  { %v77_v7 = vld [vmem:[#allocation3 + $0x38] sm:$0xff]  ;;  %v546_v8 = vpack.c.bf16 %v72_v5, %v70_v3  ;;  %v74_v10 = vld [vmem:[#allocation3 + $0x20] sm:$0xff]  ;;  %v76_v11 = vld [vmem:[#allocation3 + $0x30] sm:$0xff]  ;;  %s747_s24 = scalar_lea.vmem %s489_s23, 256  ;;  %p752_p11 = scmp.lt.s32.totalorder %s489_s23, %s489_s23 }
  0x3a   :  { %v548_v9 = vpack.c.bf16 %v77_v7, %v75_v6  ;;  %v79_v12 = vld [vmem:[#allocation3 + $0x48] sm:$0xff]  ;;  %545 = vmatprep.subr.bf16.mxu0 %v544_v4  ;;  %v81_v13 = vld [vmem:[#allocation3 + $0x58] sm:$0xff]  ;;  %v550_v14 = vpack.c.bf16 %v76_v11, %v74_v10  ;;  %v78_v16 = vld [vmem:[#allocation3 + $0x40] sm:$0xff]  ;;  %p748_p10 = scmp.ne.s32.totalorder %s489_s23, %s747_s24  ;;  %p753_p12 = scmp.lt.s32.totalorder %s747_s24, %s747_s24 }
  0x3b   :  { %547 = vmatpush1.bf16.msra.mxu0 %v546_v8  ;;  %v552_v15 = vpack.c.bf16 %v81_v13, %v79_v12  ;;  %v80_v17 = vld [vmem:[#allocation3 + $0x50] sm:$0xff]  ;;  %v83_v18 = vld [vmem:[#allocation3 + $0x68] sm:$0xff]  ;;  %v85_v19 = vld [vmem:[#allocation3 + $0x78] sm:$0xff] }
  0x3c   :  { %549 = vmatprep.subr.bf16.mxu0 %v548_v9  ;;  %v554_v20 = vpack.c.bf16 %v80_v17, %v78_v16  ;;  %v82_v21 = vld [vmem:[#allocation3 + $0x60] sm:$0xff]  ;;  %v556_v22 = vpack.c.bf16 %v85_v19, %v83_v18  ;;  %v84_v23 = vld [vmem:[#allocation3 + $0x70] sm:$0xff]  ;;  %v192_v24 = vld [vmem:[#allocation6 + $0x8] sm:$0xff]  ;;  %p754_p13 = por %p753_p12, %p752_p11 }
  0x3d   :  { %v194_v25 = vld [vmem:[#allocation6 + $0x18] sm:$0xff]  ;;  %v87_v26 = vld [vmem:[#allocation3 + $0x88] sm:$0xff]  ;;  %v191_v29 = vld [vmem:[#allocation6] sm:$0xff]  ;;  %v558_v32 = vpack.c.bf16 %v84_v23, %v82_v21 }
  0x3e   :  { %v89_v27 = vld [vmem:[#allocation3 + $0x98] sm:$0xff]  ;;  %v576_v28 = vpack.c.bf16 %v194_v25, %v192_v24  ;;  %v86_v30 = vld [vmem:[#allocation3 + $0x80] sm:$0xff]  ;;  %v193_v31 = vld [vmem:[#allocation6 + $0x10] sm:$0xff]  ;;  %p755_p0 = pnand %p754_p13, %p748_p10 }
  0x3f   :  { %551 = vmatpush1.bf16.msra.mxu0 %v550_v14  ;;  %v88_v33 = vld [vmem:[#allocation3 + $0x90] sm:$0xff]  ;;  %v578_v34 = vpack.c.bf16 %v193_v31, %v191_v29  ;;  %v196_v35 = vld [vmem:[#allocation6 + $0x28] sm:$0xff]  ;;  %v198_v36 = vld [vmem:[#allocation6 + $0x38] sm:$0xff]  ;;  %v560_v37 = vpack.c.bf16 %v89_v27, %v87_v26 }
  0x40   :  { %553 = vmatprep.subr.bf16.mxu0 %v552_v15  ;;  %577 = vmatprep.subr.bf16.mxu1 %v576_v28  ;;  %v580_v38 = vpack.c.bf16 %v198_v36, %v196_v35  ;;  %v195_v39 = vld [vmem:[#allocation6 + $0x20] sm:$0xff]  ;;  %v197_v40 = vld [vmem:[#allocation6 + $0x30] sm:$0xff]  ;;  %v200_v41 = vld [vmem:[#allocation6 + $0x48] sm:$0xff]  ;;  %v562_v49 = vpack.c.bf16 %v88_v33, %v86_v30 }
  0x41   :  { %v91_v42 = vld [vmem:[#allocation3 + $0xa8] sm:$0xff]  ;;  %v93_v43 = vld [vmem:[#allocation3 + $0xb8] sm:$0xff]  ;;  %579 = vmatpush1.bf16.msra.mxu1 %v578_v34  ;;  %v582_v44 = vpack.c.bf16 %v197_v40, %v195_v39  ;;  %v199_v47 = vld [vmem:[#allocation6 + $0x40] sm:$0xff] }
  0x42   :  { %v202_v45 = vld [vmem:[#allocation6 + $0x58] sm:$0xff]  ;;  %581 = vmatprep.subr.bf16.mxu1 %v580_v38  ;;  %v201_v48 = vld [vmem:[#allocation6 + $0x50] sm:$0xff]  ;;  %v204_v50 = vld [vmem:[#allocation6 + $0x68] sm:$0xff]  ;;  %v564_v52 = vpack.c.bf16 %v93_v43, %v91_v42 }
  0x43   :  { %555 = vmatpush1.bf16.msra.mxu0 %v554_v20  ;;  %v584_v46 = vpack.c.bf16 %v202_v45, %v200_v41  ;;  %v206_v51 = vld [vmem:[#allocation6 + $0x78] sm:$0xff]  ;;  %v90_v53 = vld [vmem:[#allocation3 + $0xa0] sm:$0xff]  ;;  %v92_v54 = vld [vmem:[#allocation3 + $0xb0] sm:$0xff]  ;;  %v586_v57 = vpack.c.bf16 %v201_v48, %v199_v47 }
  0x44   :  { %557 = vmatprep.subr.bf16.mxu0 %v556_v22  ;;  %v95_v55 = vld [vmem:[#allocation3 + $0xc8] sm:$0xff]  ;;  %v97_v56 = vld [vmem:[#allocation3 + $0xd8] sm:$0xff]  ;;  %v588_v58 = vpack.c.bf16 %v206_v51, %v204_v50  ;;  %v203_v59 = vld [vmem:[#allocation6 + $0x60] sm:$0xff]  ;;  %v566_v61 = vpack.c.bf16 %v92_v54, %v90_v53 }
  0x45   :  { %583 = vmatpush1.bf16.msra.mxu1 %v582_v44  ;;  %v205_v60 = vld [vmem:[#allocation6 + $0x70] sm:$0xff]  ;;  %v208_v62 = vld [vmem:[#allocation6 + $0x88] sm:$0xff]  ;;  %v210_v63 = vld [vmem:[#allocation6 + $0x98] sm:$0xff]  ;;  %v568_v1 = vpack.c.bf16 %v97_v56, %v95_v55 }
  0x46   :  { %585 = vmatprep.subr.bf16.mxu1 %v584_v46  ;;  %v94_v2 = vld [vmem:[#allocation3 + $0xc0] sm:$0xff]  ;;  %v96_v3 = vld [vmem:[#allocation3 + $0xd0] sm:$0xff]  ;;  %v99_v4 = vld [vmem:[#allocation3 + $0xe8] sm:$0xff]  ;;  %v590_v6 = vpack.c.bf16 %v205_v60, %v203_v59  ;;  %v592_v7 = vpack.c.bf16 %v210_v63, %v208_v62 }
  0x47   :  { %559 = vmatpush1.bf16.msra.mxu0 %v558_v32  ;;  %v101_v5 = vld [vmem:[#allocation3 + $0xf8] sm:$0xff]  ;;  %v207_v8 = vld [vmem:[#allocation6 + $0x80] sm:$0xff]  ;;  %v209_v9 = vld [vmem:[#allocation6 + $0x90] sm:$0xff]  ;;  %v570_v10 = vpack.c.bf16 %v96_v3, %v94_v2 }
  0x48   :  { %561 = vmatprep.subr.bf16.mxu0 %v560_v37  ;;  %v212_v11 = vld [vmem:[#allocation6 + $0xa8] sm:$0xff]  ;;  %v214_v12 = vld [vmem:[#allocation6 + $0xb8] sm:$0xff]  ;;  %v572_v13 = vpack.c.bf16 %v101_v5, %v99_v4  ;;  %v98_v14 = vld [vmem:[#allocation3 + $0xe0] sm:$0xff]  ;;  %v594_v16 = vpack.c.bf16 %v209_v9, %v207_v8 }
  0x49   :  { %587 = vmatpush1.bf16.msra.mxu1 %v586_v57  ;;  %v100_v15 = vld [vmem:[#allocation3 + $0xf0] sm:$0xff]  ;;  %v596_v17 = vpack.c.bf16 %v214_v12, %v212_v11  ;;  %v211_v18 = vld [vmem:[#allocation6 + $0xa0] sm:$0xff]  ;;  %v216_v21 = vld [vmem:[#allocation6 + $0xc8] sm:$0xff] }
  0x4a   :  { %589 = vmatprep.subr.bf16.mxu1 %v588_v58  ;;  %v213_v19 = vld [vmem:[#allocation6 + $0xb0] sm:$0xff]  ;;  %v574_v20 = vpack.c.bf16 %v100_v15, %v98_v14  ;;  %v218_v22 = vld [vmem:[#allocation6 + $0xd8] sm:$0xff]  ;;  %v215_v25 = vld [vmem:[#allocation6 + $0xc0] sm:$0xff] }
  0x4b   :  { %563 = vmatpush1.bf16.msra.mxu0 %v562_v49  ;;  %v598_v23 = vpack.c.bf16 %v213_v19, %v211_v18  ;;  %v600_v24 = vpack.c.bf16 %v218_v22, %v216_v21  ;;  %v217_v26 = vld [vmem:[#allocation6 + $0xd0] sm:$0xff]  ;;  %v68_v27 = vld [vmem:[%s904_s0] sm:$0xff]  ;;  %v220_v28 = vld [vmem:[#allocation6 + $0xe8] sm:$0xff] }
  0x4c   :  { %565 = vmatprep.subr.bf16.mxu0 %v564_v52  ;;  %v222_v29 = vld [vmem:[#allocation6 + $0xf8] sm:$0xff]  ;;  %v602_v30 = vpack.c.bf16 %v217_v26, %v215_v25  ;;  %v219_v32 = vld [vmem:[#allocation6 + $0xe0] sm:$0xff]  ;;  %v221_v33 = vld [vmem:[#allocation6 + $0xf0] sm:$0xff] }
  0x4d   :  { %591 = vmatpush1.bf16.msra.mxu1 %v590_v6  ;;  %v604_v31 = vpack.c.bf16 %v222_v29, %v220_v28  ;;  %v69_v34 = vld [vmem:[%s904_s0 + $0x8] sm:$0xff]  ;;  %v606_v35 = vpack.c.bf16 %v221_v33, %v219_v32  ;;  %v360_v36 = vld [vmem:[#allocation8 + $0x80] sm:$0xff]  ;;  %v362_v42 = vld [vmem:[#allocation8 + $0x90] sm:$0xff] }
  0x4e   :  { %593 = vmatprep.subr.bf16.mxu1 %v592_v7  ;;  %v361_v37 = vld [vmem:[#allocation8 + $0x88] sm:$0xff]  ;;  %v344_v39 = vld [vmem:[#allocation8] sm:$0xff]  ;;  %v363_v43 = vld [vmem:[#allocation8 + $0x98] sm:$0xff] }
  0x4f   :  { %567 = vmatpush1.bf16.msra.mxu0 %v566_v61  ;;  %v608_v38 = vpack.c.bf16 %v361_v37, %v360_v36  ;;  %v345_v40 = vld [vmem:[#allocation8 + $0x8] sm:$0xff]  ;;  %v612_v44 = vpack.c.bf16 %v363_v43, %v362_v42  ;;  %v346_v45 = vld [vmem:[#allocation8 + $0x10] sm:$0xff]  ;;  %v347_v46 = vld [vmem:[#allocation8 + $0x18] sm:$0xff] }
  0x50   :  { %569 = vmatprep.subr.bf16.mxu0 %v568_v1  ;;  %v610_v41 = vpack.c.bf16 %v345_v40, %v344_v39  ;;  %v614_v47 = vpack.c.bf16 %v347_v46, %v346_v45  ;;  %v365_v48 = vld [vmem:[#allocation8 + $0xa8] sm:$0xff]  ;;  %v348_v50 = vld [vmem:[#allocation8 + $0x20] sm:$0xff]  ;;  %v366_v53 = vld [vmem:[#allocation8 + $0xb0] sm:$0xff] }
  0x51   :  { %595 = vmatpush1.bf16.msra.mxu1 %v594_v16  ;;  %v349_v51 = vld [vmem:[#allocation8 + $0x28] sm:$0xff]  ;;  %v367_v54 = vld [vmem:[#allocation8 + $0xb8] sm:$0xff]  ;;  %v350_v56 = vld [vmem:[#allocation8 + $0x30] sm:$0xff] }
  0x52   :  { %597 = vmatprep.subr.bf16.mxu1 %v596_v17  ;;  %v618_v52 = vpack.c.bf16 %v349_v51, %v348_v50  ;;  %v620_v55 = vpack.c.bf16 %v367_v54, %v366_v53  ;;  %v351_v57 = vld [vmem:[#allocation8 + $0x38] sm:$0xff]  ;;  %v368_v59 = vld [vmem:[#allocation8 + $0xc0] sm:$0xff]  ;;  %v369_v60 = vld [vmem:[#allocation8 + $0xc8] sm:$0xff] }
  0x53   :  { %571 = vmatpush1.bf16.msra.mxu0 %v570_v10  ;;  %v622_v58 = vpack.c.bf16 %v351_v57, %v350_v56  ;;  %v624_v61 = vpack.c.bf16 %v369_v60, %v368_v59  ;;  %v352_v62 = vld [vmem:[#allocation8 + $0x40] sm:$0xff]  ;;  %v353_v63 = vld [vmem:[#allocation8 + $0x48] sm:$0xff]  ;;  %v370_v2 = vld [vmem:[#allocation8 + $0xd0] sm:$0xff] }
  0x54   :  { %573 = vmatprep.subr.bf16.mxu0 %v572_v13  ;;  %v626_v1 = vpack.c.bf16 %v353_v63, %v352_v62  ;;  %v371_v3 = vld [vmem:[#allocation8 + $0xd8] sm:$0xff]  ;;  %v354_v5 = vld [vmem:[#allocation8 + $0x50] sm:$0xff]  ;;  %v372_v8 = vld [vmem:[#allocation8 + $0xe0] sm:$0xff] }
  0x55   :  { %599 = vmatpush1.bf16.msra.mxu1 %v598_v23  ;;  %v628_v4 = vpack.c.bf16 %v371_v3, %v370_v2  ;;  %v355_v6 = vld [vmem:[#allocation8 + $0x58] sm:$0xff]  ;;  %v373_v9 = vld [vmem:[#allocation8 + $0xe8] sm:$0xff]  ;;  %v356_v11 = vld [vmem:[#allocation8 + $0x60] sm:$0xff] }
  0x56   :  { %601 = vmatprep.subr.bf16.mxu1 %v600_v24  ;;  %v630_v7 = vpack.c.bf16 %v355_v6, %v354_v5  ;;  %v632_v10 = vpack.c.bf16 %v373_v9, %v372_v8  ;;  %v357_v12 = vld [vmem:[#allocation8 + $0x68] sm:$0xff]  ;;  %v374_v14 = vld [vmem:[#allocation8 + $0xf0] sm:$0xff]  ;;  %v375_v15 = vld [vmem:[#allocation8 + $0xf8] sm:$0xff] }
  0x57   :  { %575 = vmatpush1.bf16.msra.mxu0 %v574_v20  ;;  %v634_v13 = vpack.c.bf16 %v357_v12, %v356_v11  ;;  %v636_v16 = vpack.c.bf16 %v375_v15, %v374_v14  ;;  %v358_v17 = vld [vmem:[#allocation8 + $0x70] sm:$0xff]  ;;  %v359_v18 = vld [vmem:[#allocation8 + $0x78] sm:$0xff]  ;;  %v104_v20 = vlaneseq  ;;  %v102_v23 = vld [vmem:[%s906_s2] sm:$0x3] }
  0x58   :  { %609 = vmatprep.subr.bf16.mxu0 %v608_v38  ;;  %v638_v19 = vpack.c.bf16 %v359_v18, %v358_v17  ;;  %v505_v8 = vld [vmem:[%s910_s6] ss:$0 sm:$0xff] }
  0x59   :  { %603 = vmatpush1.bf16.msra.mxu1 %v602_v30  ;;  %v105_v21 = vshrl.u32 %v104_v20, 7 }
  0x5a   :  { %179 = vmatmul.mubr.f32.vlgmr.msra.gmra.mrb[0].mxu0 %v68_v27  ;;  %605 = vmatprep.subr.bf16.mxu1 %v604_v31 }
  0x5b   :  { %184 = vmatprep.mubr.f32.mxu0 %v782_v0  ;;  %611 = vmatpush3.bf16.msra.mxu0 %v610_v41  ;;  %v106_v22 = vsub.s32 0, %v105_v21  ;;  %v110_v24 = vsub.s32 1, %v105_v21 }
  0x5c   :  { %613 = vmatprep.subr.bf16.mxu0 %v612_v44 }
  0x5d   :  { %607 = vmatpush1.bf16.msra.mxu1 %v606_v35  ;;  %v107_v25 = vrot.slane %v102_v23, %v106_v22  ;;  %v111_v26 = vrot.slane %v102_v23, %v110_v24 }
  0x5e   :  { %185 = vmatmul.mubr.f32.gmra.mrb[2].mxu0 %v69_v34  ;;  %640 = vmatprep.subr.bf16.mxu1 %v608_v38 }
  0x5f   :  { %615 = vmatpush3.bf16.msra.mxu0 %v614_v47 }
  0x60   :  { %300 = vmatmul.mubr.f32.vlgmr.msra.gmra.mrb[0].mxu1 %v68_v27 }
  0x61   :  { %305 = vmatprep.mubr.f32.mxu1 %v782_v0  ;;  %648 = vmatpush3.bf16.msra.mxu1 %v610_v41  ;;  %v364_v0 = vld [vmem:[#allocation8 + $0xa0] sm:$0xff] }
  0x62   :  { %641 = vmatprep.subr.bf16.mxu1 %v612_v44  ;;  %v616_v49 = vpack.c.bf16 %v365_v48, %v364_v0 }
  0x64   :  { %306 = vmatmul.mubr.f32.gmra.mrb[2].mxu1 %v69_v34  ;;  %617 = vmatprep.subr.bf16.mxu0 %v616_v49 }
  0x65   :  { %649 = vmatpush3.bf16.msra.mxu1 %v614_v47  ;;  %619 = vmatpush3.bf16.msra.mxu0 %v618_v52 }
  0x66   :  { %642 = vmatprep.subr.bf16.mxu1 %v616_v49  ;;  %621 = vmatprep.subr.bf16.mxu0 %v620_v55  ;;  %v223_v49 = vld [vmem:[%s908_s4] sm:$0x3] }
  0x67   :  { %v228_v51 = vrot.slane %v223_v49, %v106_v22 }
  0x69   :  { %650 = vmatpush3.bf16.msra.mxu1 %v618_v52  ;;  %623 = vmatpush3.bf16.msra.mxu0 %v622_v58  ;;  %v232_v52 = vrot.slane %v223_v49, %v110_v24 }
  0x6a   :  { %643 = vmatprep.subr.bf16.mxu1 %v620_v55  ;;  %625 = vmatprep.subr.bf16.mxu0 %v624_v61 }
  0x6d   :  { %651 = vmatpush3.bf16.msra.mxu1 %v622_v58  ;;  %627 = vmatpush3.bf16.msra.mxu0 %v626_v1 }
  0x6e   :  { %644 = vmatprep.subr.bf16.mxu1 %v624_v61  ;;  %629 = vmatprep.subr.bf16.mxu0 %v628_v4 }
  0x71   :  { %652 = vmatpush3.bf16.msra.mxu1 %v626_v1  ;;  %631 = vmatpush3.bf16.msra.mxu0 %v630_v7 }
  0x72   :  { %645 = vmatprep.subr.bf16.mxu1 %v628_v4  ;;  %633 = vmatprep.subr.bf16.mxu0 %v632_v10 }
  0x75   :  { %653 = vmatpush3.bf16.msra.mxu1 %v630_v7  ;;  %635 = vmatpush3.bf16.msra.mxu0 %v634_v13 }
  0x76   :  { %646 = vmatprep.subr.bf16.mxu1 %v632_v10  ;;  %637 = vmatprep.subr.bf16.mxu0 %v636_v16 }
  0x79   :  { %654 = vmatpush3.bf16.msra.mxu1 %v634_v13  ;;  %639 = vmatpush3.bf16.msra.mxu0 %v638_v19 }
  0x7a   :  { %647 = vmatprep.subr.bf16.mxu1 %v636_v16 }
  0x7d   :  { %655 = vmatpush3.bf16.msra.mxu1 %v638_v19 }
 0x12d   :  { %v180_v27 = vpop.f32.mrb[0].mxu0 }
 0x12e   :  { %v181_v28 = vadd.f32 %v180_v27, %v107_v25  ;;  %v182_v29 = vpop.f32.mrb[1].mxu0 }
 0x12f   :  { %v183_v30 = vadd.f32 %v182_v29, %v111_v26 }
 0x130   :  { %v501_v31 = vmul.f32 -1.442695, %v181_v28 }
 0x131   :  { %v502_v32 = vmul.f32 -1.442695, %v183_v30  ;;  %v186_v33 = vpop.f32.mrb[2].mxu0 }
 0x132   :  { %665 = vpow2.f32 %v501_v31  ;;  %v187_v34 = vadd.f32 %v186_v33, %v107_v25  ;;  %v188_v35 = vpop.f32.mrb[3].mxu0 }
 0x133   :  { %667 = vpow2.f32 %v502_v32  ;;  %v189_v36 = vadd.f32 %v188_v35, %v111_v26  ;;  %v301_v39 = vpop.f32.mrb[0].mxu1 }
 0x134   :  { %v503_v37 = vmul.f32 -1.442695, %v187_v34  ;;  %v303_v40 = vpop.f32.mrb[1].mxu1  ;;  %v302_v53 = vadd.f32 %v301_v39, %v228_v51 }
 0x135   :  { %v504_v38 = vmul.f32 -1.442695, %v189_v36  ;;  %v304_v55 = vadd.f32 %v303_v40, %v232_v52 }
 0x136   :  { %669 = vpow2.f32 %v503_v37 }
 0x137   :  { %671 = vpow2.f32 %v504_v38  ;;  %v307_v41 = vpop.f32.mrb[2].mxu1 }
 0x138   :  { %v309_v43 = vpop.f32.mrb[3].mxu1  ;;  %v308_v60 = vadd.f32 %v307_v41, %v228_v51 }
 0x139   :  { %v310_v63 = vadd.f32 %v309_v43, %v232_v52 }
 0x13c   :  { %v666_v42 = vpop.eup %665 }
 0x13d   :  { %v668_v44 = vpop.eup %667  ;;  %v324_v45 = vadd.f32 1.0, %v666_v42 }
 0x13e   :  { %v325_v46 = vadd.f32 1.0, %v668_v44 }
 0x13f   :  { %673 = vrcp.f32 %v324_v45 }
 0x140   :  { %v670_v47 = vpop.eup %669  ;;  %675 = vrcp.f32 %v325_v46 }
 0x141   :  { %v672_v0 = vpop.eup %671  ;;  %v326_v48 = vadd.f32 1.0, %v670_v47 }
 0x142   :  { %v327_v50 = vadd.f32 1.0, %v672_v0 }
 0x143   :  { %677 = vrcp.f32 %v326_v48 }
 0x144   :  { %679 = vrcp.f32 %v327_v50 }
 0x149   :  { %v674_v54 = vpop.eup %673 }
 0x14a   :  { %v676_v56 = vpop.eup %675  ;;  %v336_v57 = vmul.f32 %v674_v54, %v181_v28 }
 0x14b   :  { %v337_v58 = vmul.f32 %v676_v56, %v183_v30 }
 0x14c   :  { %v340_v59 = vmul.f32 %v336_v57, %v302_v53 }
 0x14d   :  { %v678_v61 = vpop.eup %677  ;;  %v341_v62 = vmul.f32 %v337_v58, %v304_v55 }
 0x14e   :  { %v680_v1 = vpop.eup %679  ;;  %v338_v2 = vmul.f32 %v678_v61, %v187_v34 }
 0x14f   :  { %v339_v3 = vmul.f32 %v680_v1, %v189_v36  ;;  %440 = vmatprep.mubr.f32.mxu0 %v341_v62 }
 0x150   :  { %v342_v4 = vmul.f32 %v338_v2, %v308_v60  ;;  %441 = vmatmul.mubr.f32.vlgmr.msra.gmra.mrb[4].mxu0 %v340_v59 }
 0x151   :  { %v343_v5 = vmul.f32 %v339_v3, %v310_v63 }
 0x153   :  { %445 = vmatprep.mubr.f32.mxu1 %v343_v5 }
 0x154   :  { %446 = vmatmul.mubr.f32.vlgmr.msra.gmra.mrb[4].mxu1 %v342_v4 }
 0x223   :  { %v538_v6 = vpop.f32.mrb[4].mxu0 }
 0x224   :  { %v539_v7 = vpop.f32.mrb[5].mxu0 }
 0x225   :  { %v540_v9 = vadd.f32 %v539_v7, %v538_v6 }
 0x227   :  { %v479_v10 = vadd.f32 %v540_v9, %v505_v8  ;;  %v541_v11 = vpop.f32.mrb[4].mxu1 }
 0x228   :  { %v542_v12 = vpop.f32.mrb[5].mxu1 }
 0x229   :  { %481 = vst [vmem:[#allocation9] sm:$0xff] %v479_v10  ;;  %v543_v13 = vadd.f32 %v542_v12, %v541_v11 }
 0x22b   :  { %v480_v14 = vadd.f32 %v543_v13, %v505_v8 }
 0x22d   :  { %482 = vst [vmem:[#allocation9 + $0x8] sm:$0xff] %v480_v14 }
 0x22e   :  { %758 = shalt.err (!%p755_p0)
}
 0x22f   :  { %s759_s25 = scalar_lea.hbm %s911_s7, 256 }
 0x230   :  { %p760_p1 = scmp.ne.s32.totalorder %s911_s7, %s759_s25  ;;  %p763_p2 = scmp.lt.u32.totalorder %s759_s25, %s911_s7 }
 0x232   :  { %p765_p3 = pnand %p763_p2, %p760_p1 }
 0x234   :  { %768 = shalt.err (!%p765_p3)
}
 0x235   :  { %494 = dma.vmem_to_hbm [thread:$0]  %s489_s23, 256, %s911_s7, [#allocation5], %s780_s1, %s780_s1, %s781_s27  }
 0x236   :  { %773 = dma.done.wait [#allocation5], 256  }
 0x237   :  { %774 = vsyncadd [#allocation5], 4294967040 }
 0x238   :  { %498 = vsyncpa [#allocation4], 1 }
 0x239   :  { %499 = vsyncpa [#allocation7], 1 }
 0x23a   :  { %500 = vsyncpa [#allocation5], 1 }

</bundles_post_ra>
